<compile_context>
chip_gen: v7x
topology: tpu7x:2x2x1
jax: 0.10.0
libtpu: 0.0.40
codegen_flags: <defaults>
</compile_context>

<pallas_src>
import functools

import jax
import jax.numpy as jnp
from jax.experimental import pallas as pl
from jax.experimental.pallas import tpu as pltpu


def _round_up(a: int, b: int) -> int:
    return ((a + b - 1) // b) * b


def _vmem_capacity_bytes() -> int:
    """Per-TensorCore VMEM capacity; conservative fallback if the query fails."""
    try:
        info = pltpu.get_tpu_info()
        cap = int(getattr(info, "vmem_capacity_bytes", 0) or 0)
        if cap > 0:
            return cap
    except Exception:
        pass
    return 64 << 20  # v7x per-TC VMEM; safe lower bound for v5e/v6e too.


def _multiway_rmsnorm_kernel(x_ref, sel_ref, w_ref, o_ref, *, eps):
    # x_ref:   (TB, H)  token block
    # sel_ref: (TB, 1)  f32 selector per token (0.0 -> expert 0, 1.0 -> expert 1)
    # w_ref:   (2,  H)  expert RMSNorm weights (row e = weights of expert e)
    # o_ref:   (TB, H)
    x = x_ref[...].astype(jnp.float32)
    var = jnp.mean(x * x, axis=-1, keepdims=True)            # (TB, 1)
    x_norm = x * jax.lax.rsqrt(var + eps)                     # (TB, H)

    # Exact per-token expert-weight gather for num_multiway == 2.
    w0 = w_ref[0:1, :].astype(jnp.float32)                    # (1, H)
    w1 = w_ref[1:2, :].astype(jnp.float32)                    # (1, H)
    w = jnp.where(sel_ref[...] > 0.5, w1, w0)                 # (TB, H)

    o_ref[...] = (w * x_norm).astype(o_ref.dtype)


def multiway_rmsnorm(hidden_states, multiway_indices, weights, *,
                     eps=1e-6, max_token_block=1024):
    """hidden_states: (B, S, H) float; multiway_indices: (B, S) int;
    weights: (2, H) float (per-expert RMSNorm weight). Returns (B, S, H)."""
    B, S, H = hidden_states.shape
    N = B * S

    x = hidden_states.reshape(N, H)
    # Tiny (N,1) f32 selector precomputed once in the wrapper (drops the
    # in-kernel int clip / convert). Any nonzero index -> expert 1 (num_multiway=2).
    sel = (multiway_indices.reshape(N, 1) != 0).astype(jnp.float32)

    x_bytes = jnp.dtype(hidden_states.dtype).itemsize
    w_bytes = jnp.dtype(weights.dtype).itemsize

    ROW = 32  # sublane multiple safe for f32 / bf16 / int8 block shapes

    # ---- budget-driven token block -------------------------------------
    cap = _vmem_capacity_bytes()
    budget = cap * 3 // 4                     # ~48 MiB on v7x, ~96 MiB on v5e/v6e
    w_const = 2 * (2 * H * w_bytes)           # double-buffered constant (2, H) block
    # Per-row VMEM: double-buffered x-in + out tiles, lane-padded selector tile,
    # plus ~3 materialized f32 intermediates in the body (x, x_norm, w).
    per_row = 2 * (2 * H * x_bytes) + 2 * 128 * 4 + 3 * H * 4
    tb = max((budget - w_const) // per_row, ROW)
    tb = (tb // ROW) * ROW
    tb = min(tb, max_token_block, _round_up(N, ROW))
    # v7x megacore: make sure the "parallel" grid axis has >= 2 steps whenever
    # N allows, so both TensorCores stream (no-op on single-TC v5e/v6e).
    if pl.cdiv(N, tb) < 2 and N > 2 * ROW:
        tb = max(_round_up(pl.cdiv(N, 2), ROW), ROW)

    grid = (pl.cdiv(N, tb),)   # ragged tail handled by Pallas: no pad, no slice

    used = tb * per_row + w_const
    vmem_limit = int(min(cap * 9 // 10, max(used * 3 // 2, 32 << 20)))

    cost = pl.CostEstimate(
        flops=4 * N * H,                      # square + mean-add + scale + weight mul
        transcendentals=N,                    # one rsqrt per token
        bytes_accessed=2 * N * H * x_bytes + N * 4 + 2 * H * w_bytes,
    )

    out = pl.pallas_call(
        functools.partial(_multiway_rmsnorm_kernel, eps=eps),
        out_shape=jax.ShapeDtypeStruct((N, H), hidden_states.dtype),
        grid_spec=pltpu.PrefetchScalarGridSpec(
            num_scalar_prefetch=0,
            grid=grid,
            in_specs=[
                pl.BlockSpec((tb, H), lambda i: (i, 0)),
                pl.BlockSpec((tb, 1), lambda i: (i, 0)),
                pl.BlockSpec((2, H), lambda i: (0, 0)),   # constant weight block
            ],
            out_specs=pl.BlockSpec((tb, H), lambda i: (i, 0)),
        ),
        compiler_params=pltpu.CompilerParams(
            dimension_semantics=("parallel",),
            vmem_limit_bytes=vmem_limit,
        ),
        cost_estimate=cost,
    )(x, sel, weights)

    return out.reshape(B, S, H)


def _reference(hidden_states, multiway_indices, weights, eps=1e-6):
    # Pure-JAX re-implementation of the PyTorch MultiwayNetwork(RMSNorm) forward.
    x = hidden_states.astype(jnp.float32)
    var = jnp.mean(x * x, axis=-1, keepdims=True)
    x_norm = x * jax.lax.rsqrt(var + eps)
    w = weights[multiway_indices].astype(jnp.float32)          # (B, S, H) gather
    return (w * x_norm).astype(hidden_states.dtype)


if __name__ == "__main__":
    key = jax.random.PRNGKey(0)
    k_x, k_idx, k_w0, k_w1, k_x2, k_idx2, k_x3, k_idx3, k_w2 = jax.random.split(key, 9)

    # Case 1: small canonical shapes (f32).
    B, S, H = 2, 8, 128
    hidden_states = jax.random.normal(k_x, (B, S, H), dtype=jnp.float32)
    multiway_indices = jax.random.randint(k_idx, (B, S), 0, 2, dtype=jnp.int32)
    w0 = jnp.ones((H,), jnp.float32) + 0.1 * jax.random.normal(k_w0, (H,), jnp.float32)
    w1 = jnp.ones((H,), jnp.float32) + 0.1 * jax.random.normal(k_w1, (H,), jnp.float32)
    weights = jnp.stack([w0, w1], axis=0)                      # (2, H)

    out = jax.block_until_ready(multiway_rmsnorm(hidden_states, multiway_indices, weights))
    ref = _reference(hidden_states, multiway_indices, weights)
    assert out.shape == hidden_states.shape and out.dtype == hidden_states.dtype
    assert jnp.allclose(out, ref, atol=1e-5, rtol=1e-5)

    # Case 2: ragged token count (N = 111, not a multiple of the block) --
    # exercises the pad-free partial last block path.
    B2, S2 = 3, 37
    hs2 = jax.random.normal(k_x2, (B2, S2, H), dtype=jnp.float32)
    idx2 = jax.random.randint(k_idx2, (B2, S2), 0, 2, dtype=jnp.int32)
    out2 = jax.block_until_ready(multiway_rmsnorm(hs2, idx2, weights))
    ref2 = _reference(hs2, idx2, weights)
    assert jnp.allclose(out2, ref2, atol=1e-5, rtol=1e-5)

    # Case 3: bf16 activations + bf16 weights, custom eps (rms_norm_eps=1e-5).
    B3, S3, H3 = 2, 19, 256
    hs3 = jax.random.normal(k_x3, (B3, S3, H3), dtype=jnp.bfloat16)
    idx3 = jax.random.randint(k_idx3, (B3, S3), 0, 2, dtype=jnp.int32)
    w3 = (jnp.ones((2, H3), jnp.float32)
          + 0.1 * jax.random.normal(k_w2, (2, H3), jnp.float32)).astype(jnp.bfloat16)
    out3 = jax.block_until_ready(multiway_rmsnorm(hs3, idx3, w3, eps=1e-5))
    ref3 = _reference(hs3, idx3, w3, eps=1e-5)
    assert out3.dtype == jnp.bfloat16
    assert jnp.allclose(out3.astype(jnp.float32), ref3.astype(jnp.float32), atol=3e-2, rtol=3e-2)

    print("KERNEL_OK")
</pallas_src>

<mosaic_0001>
module attributes {stable_mosaic.version = 11 : i64} {
  func.func @_multiway_rmsnorm_kernel(%arg0: i32, %arg1: memref<32x128xf32, #tpu.memory_space<vmem>>, %arg2: memref<32x1xf32, #tpu.memory_space<vmem>>, %arg3: memref<2x128xf32, #tpu.memory_space<vmem>>, %arg4: memref<32x128xf32, #tpu.memory_space<vmem>>) attributes {dimension_semantics = [#tpu.dimension_semantics<parallel>], iteration_bounds = array<i64: 1>, scalar_prefetch = 0 : i64, scratch_operands = 0 : i64, tpu.core_type = #tpu.core_type<tc>, window_params = [{transform_indices = @transform_0, window_bounds = array<i64: 32, 128>}, {transform_indices = @transform_1, window_bounds = array<i64: 32, 1>}, {pipeline_mode = #tpu.pipeline_mode<synchronous>, transform_indices = @transform_2, window_bounds = array<i64: 2, 128>}, {transform_indices = @transform_3, window_bounds = array<i64: 32, 128>}]} {
    %c0 = arith.constant 0 : index
    %c0_0 = arith.constant 0 : index
    %0 = vector.load %arg1[%c0, %c0_0] : memref<32x128xf32, #tpu.memory_space<vmem>>, vector<32x128xf32>
    %1 = arith.mulf %0, %0 : vector<32x128xf32>
    %cst = arith.constant dense<0.000000e+00> : vector<32xf32>
    %2 = vector.multi_reduction <add>, %1, %cst [1] : vector<32x128xf32> to vector<32xf32>
    %3 = vector.shape_cast %2 : vector<32xf32> to vector<32x1xf32>
    %cst_1 = arith.constant 1.280000e+02 : f32
    %4 = vector.broadcast %cst_1 : f32 to vector<32x1xf32>
    %5 = arith.divf %3, %4 : vector<32x1xf32>
    %cst_2 = arith.constant 9.99999997E-7 : f32
    %6 = vector.broadcast %cst_2 : f32 to vector<32x1xf32>
    %7 = arith.addf %5, %6 : vector<32x1xf32>
    %8 = math.rsqrt %7 : vector<32x1xf32>
    %9 = vector.broadcast %8 : vector<32x1xf32> to vector<32x128xf32>
    %10 = arith.mulf %0, %9 : vector<32x128xf32>
    %c0_3 = arith.constant 0 : index
    %c0_4 = arith.constant 0 : index
    %11 = vector.load %arg3[%c0_3, %c0_4] : memref<2x128xf32, #tpu.memory_space<vmem>>, vector<1x128xf32>
    %c1 = arith.constant 1 : index
    %c0_5 = arith.constant 0 : index
    %12 = vector.load %arg3[%c1, %c0_5] : memref<2x128xf32, #tpu.memory_space<vmem>>, vector<1x128xf32>
    %c0_6 = arith.constant 0 : index
    %c0_7 = arith.constant 0 : index
    %13 = vector.load %arg2[%c0_6, %c0_7] : memref<32x1xf32, #tpu.memory_space<vmem>>, vector<32x1xf32>
    %cst_8 = arith.constant 5.000000e-01 : f32
    %14 = vector.broadcast %cst_8 : f32 to vector<32x1xf32>
    %15 = arith.cmpf ogt, %13, %14 : vector<32x1xf32>
    %16 = vector.shape_cast %15 : vector<32x1xi1> to vector<32x1xi1>
    %17 = vector.broadcast %16 : vector<32x1xi1> to vector<32x128xi1>
    %18 = vector.shape_cast %12 : vector<1x128xf32> to vector<1x128xf32>
    %19 = vector.broadcast %18 : vector<1x128xf32> to vector<32x128xf32>
    %20 = vector.shape_cast %11 : vector<1x128xf32> to vector<1x128xf32>
    %21 = vector.broadcast %20 : vector<1x128xf32> to vector<32x128xf32>
    %22 = arith.select %17, %19, %21 : vector<32x128xi1>, vector<32x128xf32>
    %23 = arith.mulf %22, %10 : vector<32x128xf32>
    %c0_9 = arith.constant 0 : index
    %c0_10 = arith.constant 0 : index
    %24 = vector.load %arg4[%c0_9, %c0_10] : memref<32x128xf32, #tpu.memory_space<vmem>>, vector<32x128xf32>
    tpu.vector_store %arg4[%c0_9, %c0_10], %23 {strides = array<i32>} : memref<32x128xf32, #tpu.memory_space<vmem>>, vector<32x128xf32>,
    return
  }
  func.func @transform_0(%arg0: i32) -> (i32, i32) {
    %c0_i32 = arith.constant 0 : i32
    %c0_i32_0 = arith.constant 0 : i32
    return %arg0, %c0_i32 : i32, i32
  }
  func.func @transform_1(%arg0: i32) -> (i32, i32) {
    %c0_i32 = arith.constant 0 : i32
    %c0_i32_0 = arith.constant 0 : i32
    return %arg0, %c0_i32 : i32, i32
  }
  func.func @transform_2(%arg0: i32) -> (i32, i32) {
    %c0_i32 = arith.constant 0 : i32
    %c0_i32_0 = arith.constant 0 : i32
    %c0_i32_1 = arith.constant 0 : i32
    return %c0_i32, %c0_i32_0 : i32, i32
  }
  func.func @transform_3(%arg0: i32) -> (i32, i32) {
    %c0_i32 = arith.constant 0 : i32
    %c0_i32_0 = arith.constant 0 : i32
    return %arg0, %c0_i32 : i32, i32
  }
}

</mosaic_0001>

<bundles_post_ra>
// kernel: tpu_custom_call.1
= control target key start
LH: loop header
LB: loop body
LE: loop exit
PB: predicated region body
PF: predicated region fallthrough
CT: control target
= control target key end

     0   :  { %v154_v6 = vmov 0   ;;  %s230_s0 = inlined_call_operand.vmem [shape: f32[16,128], index: 0, kind: input, shape index: {}]   ;;  %s231_s1 = inlined_call_operand.vmem [shape: f32[16,1], index: 1, kind: input, shape index: {}]   ;;  %s232_s2 = inlined_call_operand.vmem [shape: f32[2,128], index: 2, kind: input, shape index: {}]   ;;  %s233_s3 = inlined_call_operand.hbm [shape: f32[16,128], index: 3, kind: output, shape index: {}]  }
   0x1   :  { %v17_v0 = vld [vmem:[%s230_s0 + $0x10] sm:$0xff]  ;;  %v15_v1 = vld [vmem:[%s230_s0] sm:$0xff]  ;;  %v187_v2 = vld [vmem:[%s230_s0 + $0x18] sm:$0xff]  ;;  %121 = vset.pattern.permute.xlu1 %v154_v6  ;;  %120 = vset.pattern.permute.xlu0 %v154_v6 }
   0x2   :  { %v21_v3 = vmul.f32 %v17_v0, %v17_v0  ;;  %v19_v4 = vmul.f32 %v15_v1, %v15_v1  ;;  %v192_v5 = vld [vmem:[%s230_s0 + $0x8] sm:$0xff] }
   0x3   :  { %8 = vsyncpa [#allocation3], 0  ;;  %v22_v7 = vmul.f32 %v187_v2, %v187_v2  ;;  %v20_v8 = vmul.f32 %v192_v5, %v192_v5  ;;  %v51_v9 = vld [vmem:[%s231_s1 + $0x8] sm:$0xff]  ;;  %v52_v10 = vld [vmem:[%s231_s1 + $0x10] sm:$0xff] }
   0x4   :  { %27 = vadd.xlane.f32.xlu1 %v21_v3  ;;  %23 = vadd.xlane.f32.xlu0 %v19_v4  ;;  %vm55_vm0 = vcmp.gt.f32.partialorder %v51_v9, 0.5  ;;  %v50_v11 = vld [vmem:[%s231_s1] sm:$0xff]  ;;  %vm56_vm1 = vcmp.gt.f32.partialorder %v52_v10, 0.5  ;;  %v53_v13 = vld [vmem:[%s231_s1 + $0x18] sm:$0xff] }
   0x5   :  { %v59_v12 = vsel %vm55_vm0, 1, %v154_v6  ;;  %vm54_vm2 = vcmp.gt.f32.partialorder %v50_v11, 0.5  ;;  %v60_v14 = vsel %vm56_vm1, 1, %v154_v6  ;;  %vm57_vm3 = vcmp.gt.f32.partialorder %v53_v13, 0.5  ;;  %v115_v32 = vld [vmem:[%s232_s2] ss:$0 sm:$0xff] }
   0x6   :  { %v58_v15 = vsel %vm54_vm2, 1, %v154_v6  ;;  %v61_v16 = vsel %vm57_vm3, 1, %v154_v6  ;;  %v114_v33 = vld [vmem:[%s232_s2 + $0x1] ss:$0 sm:$0xff] }
   0x8   :  { %29 = vadd.xlane.f32.xlu1 %v22_v7  ;;  %25 = vadd.xlane.f32.xlu0 %v20_v8 }
  0x19   :  { %66 = vperm.xlu1 %121, %v59_v12  }
  0x1d   :  { %69 = vperm.xlu1 %121, %v60_v14  }
  0x1e   :  { %63 = vperm.xlu0 %120, %v58_v15  }
  0x21   :  { %72 = vperm.xlu1 %121, %v61_v16  }
  0x91   :  { %v28_v17 = vpop.xlane.xlu1 %27  ;;  %v24_v18 = vpop.xlane.xlu0 %23 }
  0x92   :  { %v34_v19 = vmul.f32 0.0078125, %v28_v17  ;;  %v32_v20 = vmul.f32 0.0078125, %v24_v18 }
  0x94   :  { %v38_v21 = vadd.f32 1e-06, %v34_v19  ;;  %v36_v22 = vadd.f32 1e-06, %v32_v20 }
  0x95   :  { %v30_v23 = vpop.xlane.xlu1 %29  ;;  %v26_v24 = vpop.xlane.xlu0 %25 }
  0x96   :  { %122 = vrsqrt.f32 %v38_v21  ;;  %v35_v25 = vmul.f32 0.0078125, %v30_v23  ;;  %v33_v26 = vmul.f32 0.0078125, %v26_v24 }
  0x97   :  { %124 = vrsqrt.f32 %v36_v22 }
  0x98   :  { %v39_v27 = vadd.f32 1e-06, %v35_v25  ;;  %v37_v28 = vadd.f32 1e-06, %v33_v26 }
  0x99   :  { %v67_v29 = vpop.permute.xlu1 %66 }
  0x9a   :  { %126 = vrsqrt.f32 %v39_v27  ;;  %vm75_vm7 = vcmp.eq.s32.totalorder %v67_v29, 1 }
  0x9b   :  { %128 = vrsqrt.f32 %v37_v28  ;;  %v87_v48 = vsel %vm75_vm7, %v114_v33, %v115_v32 }
  0x9d   :  { %v70_v30 = vpop.permute.xlu1 %69  ;;  %v64_v31 = vpop.permute.xlu0 %63 }
  0x9e   :  { %vm74_vm4 = vcmp.eq.s32.totalorder %v64_v31, 1  ;;  %vm76_vm5 = vcmp.eq.s32.totalorder %v70_v30, 1 }
  0x9f   :  { %v86_v37 = vsel %vm74_vm4, %v114_v33, %v115_v32  ;;  %v88_v39 = vsel %vm76_vm5, %v114_v33, %v115_v32 }
  0xa0   :  { %v123_v34 = vpop.eup %122 }
  0xa1   :  { %v125_v35 = vpop.eup %124  ;;  %v46_v36 = vmul.f32 %v123_v34, %v17_v0  ;;  %v73_v38 = vpop.permute.xlu1 %72 }
  0xa2   :  { %v44_v40 = vmul.f32 %v125_v35, %v15_v1  ;;  %vm77_vm6 = vcmp.eq.s32.totalorder %v73_v38, 1 }
  0xa3   :  { %v92_v41 = vmul.f32 %v88_v39, %v46_v36  ;;  %v89_v47 = vsel %vm77_vm6, %v114_v33, %v115_v32 }
  0xa4   :  { %v127_v42 = vpop.eup %126  ;;  %v90_v43 = vmul.f32 %v86_v37, %v44_v40 }
  0xa5   :  { %v129_v44 = vpop.eup %128  ;;  %96 = vst [vmem:[#allocation2 + $0x10] sm:$0xff] %v92_v41  ;;  %v47_v45 = vmul.f32 %v127_v42, %v187_v2 }
  0xa6   :  { %v45_v46 = vmul.f32 %v129_v44, %v192_v5  ;;  %94 = vst [vmem:[#allocation2] sm:$0xff] %v90_v43 }
  0xa7   :  { %v93_v49 = vmul.f32 %v89_v47, %v47_v45 }
  0xa8   :  { %v91_v50 = vmul.f32 %v87_v48, %v45_v46 }
  0xa9   :  { %97 = vst [vmem:[#allocation2 + $0x18] sm:$0xff] %v93_v49 }
  0xaa   :  { %95 = vst [vmem:[#allocation2 + $0x8] sm:$0xff] %v91_v50 }
  0xab   :  { %102 = vsyncadd [#allocation3], 256  ;;  %s155_s2 = smov [#allocation2]  }
  0xac   :  { %s103_s30 = sshll.u32 %s155_s2, 4  ;;  %s104_s30 = int_to_ptr.vmem [resolvable:$true] %s103_s30 }
  0xad   :  { %s130_s4 = scalar_lea.vmem %s104_s30, 256  ;;  %s134_s5 = scalar_lea.vmem %s104_s30, 512 }
  0xae   :  { %p131_p0 = scmp.ne.s32.totalorder %s104_s30, %s130_s4  ;;  %p135_p1 = scmp.lt.s32.totalorder %s104_s30, %s104_s30 }
  0xaf   :  { %p136_p2 = scmp.lt.s32.totalorder %s134_s5, %s130_s4 }
  0xb1   :  { %p137_p3 = por %p136_p2, %p135_p1 }
  0xb3   :  { %p138_p4 = pnand %p137_p3, %p131_p0 }
  0xb5   :  { %141 = shalt.err (!%p138_p4)
}
  0xb6   :  { %s142_s8 = scalar_lea.hbm %s233_s3, 256 }
  0xb7   :  { %p143_p5 = scmp.ne.s32.totalorder %s233_s3, %s142_s8  ;;  %p146_p6 = scmp.lt.u32.totalorder %s142_s8, %s233_s3 }
  0xb9   :  { %p148_p7 = pnand %p146_p6, %p143_p5 }
  0xbb   :  { %151 = shalt.err (!%p148_p7)
}
  0xbc   :  { %s156_s13 = smov 128   ;;  %s157_s14 = smov 8  }
  0xbd   :  { %109 = dma.vmem_to_hbm [thread:$0]  %s104_s30, 256, %s233_s3, [#allocation3], %s156_s13, %s156_s13, %s157_s14  }
  0xbe   :  { %152 = dma.done.wait [#allocation3], 512  }
  0xbf   :  { %153 = vsyncadd [#allocation3], 4294966784 }
  0xc0   :  { %113 = vsyncpa [#allocation3], 1 }

</bundles_post_ra>
